<compile_context>
chip_gen: v5e
topology: v5e:2x2
jax: 0.10.0
libtpu: 0.0.40
codegen_flags: <defaults>
</compile_context>

<pallas_src>
import numpy as np
import jax
import jax.numpy as jnp
from jax.experimental import pallas as pl
from jax.experimental.pallas import tpu as pltpu

# ----------------------- small, module-consistent sizes ---------------------
N = 2                  # batch
C_IN = 8               # image channels (stand-in for the 1024 of cv_pretrained)
H_IN = W_IN = 8        # image spatial
CV_FILTER = 4          # args.cv_filter
TE_HIDDEN = 16         # args.te_hidden
GT_HIDDEN = 32         # args.rn_gt_hidden   (args.rn_gt_layer = 3)
FP_HIDDEN = 32         # args.rn_fp_hidden   (args.rn_fp_layer = 3)
A_SIZE = 10            # args.a_size
VOCAB = 32
SEQ = 8

H_OUT = W_OUT = H_IN // 2            # Conv2d(kernel=3, stride=2, padding=1)
O = H_OUT * W_OUT                    # number of "objects" (h*w of the feature map)
K_COL = C_IN * 9                     # im2col patch length
FEAT = CV_FILTER + 2                 # conv feature + (x, y) coordinate
PAIR_DIM = 2 * FEAT + TE_HIDDEN      # g_theta input width
BN_SCALE = float(1.0 / np.sqrt(1.0 + 1e-5))   # eval-mode BatchNorm2d, default stats

LANE = 128                           # vreg lane width / lane-dense output slab
PK = 4                               # pairs packed per 128-lane row (4 => v5e/v6e/v7x safe)
PKW = PK * GT_HIDDEN                 # 128 packed lane width
assert PKW == LANE
NQ = O // PK                         # j-groups per batch sample (4)
GROUP_ROWS = O * NQ                  # packed rows per batch sample (64)
K_PAD = 80                           # conv contraction width: K_COL + ones-lane, 8-padded
TE_PAD = 32                          # question contraction width: TE_HIDDEN + ones-lane, padded
ACT_ROWS = 40                        # N*O patch rows + N code rows, padded to multiple of 8


# ------------------------- single-slab parameter layout -----------------------
def _slab_layout():
    sizes = (("CONV", K_PAD),        # (K_PAD, CV_FILTER): conv weight * BN scale; row K_COL = bias
             ("W1Q", TE_PAD),        # (TE_PAD, 128): tile(W1_q) rows; row TE_HIDDEN = tile(g_b1)
             ("W1IC", 8),            # (CV_FILTER, 128): tile(W1_i conv part, x4 lanes)
             ("W1JC", 8),            # (CV_FILTER, 128): tile(W1_j conv part, x4 lanes)
             ("CI", 16),             # (O, 128): tile(coords @ W1_i[coord rows])
             ("CJ", 8),              # (NQ, 128): lane-packed coords @ W1_j[coord rows]
             ("SEL", N * O),         # (N*O, 128): lane-block selector mask (row % PK)
             ("GW2", PKW),           # (128,128): block-diag of g_w2 (4 copies)
             ("GW3", PKW),           # (128,128): block-diag of g_w3 (4 copies)
             ("FW1", PKW),           # (128, FP_HIDDEN): 4 stacked copies of f_w1 (folds pair-sum)
             ("FW2", 32),            # (FP_HIDDEN, FP_HIDDEN)
             ("FW3", 32),            # (FP_HIDDEN, 128): f_w3 zero-padded to lane-dense logits
             ("B", 8))               # bias rows: g_b2_til, g_b3_til, f_b1, f_b2, f_b3_pad
    off, r = {}, 0
    for k, n in sizes:
        off[k] = r
        r += n
    return off, r


OFF, PSLAB_ROWS = _slab_layout()


# ------------------------------- fused Pallas kernel ------------------------------
def _fused_rn_kernel(act_ref, prm_ref, out_ref):
    """Whole RN forward for the whole batch; 2 input slabs, 1 output slab, all VMEM."""
    # -- visual encoder: Conv(3x3,s2,p1) as im2col matmul; BN(eval) + conv bias folded
    #    into the weight block (patch rows carry a ones-lane) -> one matmul + ReLU.
    x = jnp.maximum(
        jnp.dot(act_ref[0:N * O, :],
                prm_ref[OFF["CONV"]:OFF["CONV"] + K_PAD, 0:CV_FILTER],
                preferred_element_type=jnp.float32), 0.0)                   # (N*O, CV)

    # -- question projection of g_theta layer 1 (W1_q and g_b1 folded via ones-lane),
    #    already lane-tiled to the 4-pair packing.
    hq = jnp.dot(act_ref[N * O:N * O + N, 0:TE_PAD],
                 prm_ref[OFF["W1Q"]:OFF["W1Q"] + TE_PAD, :],
                 preferred_element_type=jnp.float32)                        # (N, 128)

    # -- "i" half of layer 1 (identical in all 4 lane blocks); coordinate + question
    #    terms folded in BEFORE the broadcast -> pre-activation is a 2-way add only.
    hi = jnp.dot(x, prm_ref[OFF["W1IC"]:OFF["W1IC"] + CV_FILTER, :],
                 preferred_element_type=jnp.float32)                        # (N*O, 128)
    hiq = (hi.reshape(N, O, PKW)
           + prm_ref[OFF["CI"]:OFF["CI"] + O, :]
           + hq[:, None, :])                                                # (N, O, 128)

    # -- "j" half of layer 1, lane-packed (4 consecutive objects per 128-lane row):
    #    tiled matmul + lane-block selector mask + grouped-row sum (only leading-dim
    #    reshapes; no sublane->lane relayout).
    hj_rep = jnp.dot(x, prm_ref[OFF["W1JC"]:OFF["W1JC"] + CV_FILTER, :],
                     preferred_element_type=jnp.float32)                    # (N*O, 128)
    hj_msk = hj_rep * prm_ref[OFF["SEL"]:OFF["SEL"] + N * O, :]
    hj_p = (jnp.sum(hj_msk.reshape(N * NQ, PK, PKW), axis=1).reshape(N, NQ, PKW)
            + prm_ref[OFF["CJ"]:OFF["CJ"] + NQ, :])                         # (N, NQ, 128)

    # -- g_theta layer 1: 2-way broadcast-add + ReLU, flattened to a lane-dense slab.
    h = jnp.maximum(hiq[:, :, None, :] + hj_p[:, None, :, :], 0.0)          # (N, O, NQ, 128)
    h = h.reshape(N * O * NQ, PKW)                                          # (128, 128)

    # -- g_theta layers 2/3 with block-diagonal (128,128) weights (full-lane MXU/VPU).
    h = jnp.maximum(jnp.dot(h, prm_ref[OFF["GW2"]:OFF["GW2"] + PKW, :],
                            preferred_element_type=jnp.float32)
                    + prm_ref[OFF["B"] + 0:OFF["B"] + 1, :], 0.0)
    h = jnp.maximum(jnp.dot(h, prm_ref[OFF["GW3"]:OFF["GW3"] + PKW, :],
                            preferred_element_type=jnp.float32)
                    + prm_ref[OFF["B"] + 1:OFF["B"] + 2, :], 0.0)

    # -- pair-sum (.sum(1) over o^2 pairs): sublane reduction to (N,128); the remaining
    #    4-block lane reduction is folded into the f_phi layer-1 matmul below.
    rel = jnp.sum(h.reshape(N, GROUP_ROWS, PKW), axis=1)                    # (N, 128)

    # -- f_phi MLP (rn_fp_dropout omitted: eval mode => identity; last layer linear).
    f1 = jnp.maximum(jnp.dot(rel, prm_ref[OFF["FW1"]:OFF["FW1"] + PKW, 0:FP_HIDDEN],
                             preferred_element_type=jnp.float32)
                     + prm_ref[OFF["B"] + 2:OFF["B"] + 3, 0:FP_HIDDEN], 0.0)
    f2 = jnp.maximum(jnp.dot(f1, prm_ref[OFF["FW2"]:OFF["FW2"] + FP_HIDDEN, 0:FP_HIDDEN],
                             preferred_element_type=jnp.float32)
                     + prm_ref[OFF["B"] + 3:OFF["B"] + 4, 0:FP_HIDDEN], 0.0)
    out_ref[...] = (jnp.dot(f2, prm_ref[OFF["FW3"]:OFF["FW3"] + FP_HIDDEN, :],
                            preferred_element_type=jnp.float32)
                    + prm_ref[OFF["B"] + 4:OFF["B"] + 5, :])                # (N, 128)


# --------------------------------- glue --------------------------------------
def im2col(x):
    """(N, C_IN, H_IN, W_IN) -> (N, O, C_IN*9); contraction order matches
    torch weight.reshape(out, C*3*3) (channel-major, then kh, kw)."""
    xp = jnp.pad(x, ((0, 0), (0, 0), (1, 1), (1, 1)))
    taps = []
    for di in range(3):
        for dj in range(3):
            taps.append(xp[:, :, di:di + H_IN:2, dj:dj + W_IN:2])      # (N, C, Ho, Wo)
    cols = jnp.stack(taps, axis=2)                                      # (N, C, 9, Ho, Wo)
    cols = cols.reshape(N, K_COL, O)
    return jnp.transpose(cols, (0, 2, 1))                               # (N, O, K_COL)


def text_encode(question, question_length, p):
    # TODO(synk): the original text_encoder comes from init_encoders(args) (an RNN,
    # unspecified here); use a deterministic masked-mean-of-embeddings + Linear + tanh.
    e = p['emb'][question]                                              # (N, SEQ, TE_HIDDEN)
    mask = (jnp.arange(SEQ)[None, :] < question_length[:, None]).astype(jnp.float32)
    m = (e * mask[..., None]).sum(1) / jnp.maximum(mask.sum(1, keepdims=True), 1.0)
    return jnp.tanh(m @ p['w_txt'] + p['b_txt'])                        # (N, TE_HIDDEN)


def _coords():
    # rn_encode coordinate channels: x varies with row, y with column (row-major o index).
    # TODO(synk): verify linspace endpoints / axis convention against the actual rn_encode.
    xs = jnp.linspace(-H_OUT / 2.0, H_OUT / 2.0, H_OUT)
    ys = jnp.linspace(-W_OUT / 2.0, W_OUT / 2.0, W_OUT)
    xc = jnp.broadcast_to(xs[:, None], (H_OUT, W_OUT)).reshape(O, 1)
    yc = jnp.broadcast_to(ys[None, :], (H_OUT, W_OUT)).reshape(O, 1)
    return jnp.concatenate([xc, yc], 1)                                 # (O, 2)


# ------------------------- parameter slab (packed ONCE) ------------------------
def pack_params(p):
    """Fold BN / biases / coordinate constants and pre-tile + block-diagonalize every
    kernel-side weight into ONE (PSLAB_ROWS, 128) f32 slab => a single input DMA."""
    s = BN_SCALE
    w1_j = p['g_w1'][:FEAT]                      # rows multiplying feats[j]
    w1_i = p['g_w1'][FEAT:2 * FEAT]              # rows multiplying feats[i]
    w1_q = p['g_w1'][2 * FEAT:]                  # rows multiplying the question code
    coords = _coords()
    cj = coords @ w1_j[CV_FILTER:]               # (O, GT) coordinate contribution, "j" half
    ci = coords @ w1_i[CV_FILTER:]               # (O, GT) coordinate contribution, "i" half

    slab = jnp.zeros((PSLAB_ROWS, LANE), jnp.float32)

    def put(sl, name, a):
        return sl.at[OFF[name]:OFF[name] + a.shape[0], :a.shape[1]].set(a)

    # conv: weight * BN scale, with (b_conv * BN scale) as the ones-lane row.
    slab = put(slab, "CONV", jnp.concatenate([p['w_conv'] * s, p['b_conv'] * s], axis=0))
    # question projection: tile(W1_q) with tile(g_b1) as the ones-lane row.
    slab = put(slab, "W1Q", jnp.concatenate([jnp.tile(w1_q, (1, PK)),
                                             jnp.tile(p['g_b1'], (1, PK))], axis=0))
    slab = put(slab, "W1IC", jnp.tile(w1_i[:CV_FILTER], (1, PK)))
    slab = put(slab, "W1JC", jnp.tile(w1_j[:CV_FILTER], (1, PK)))
    slab = put(slab, "CI", jnp.tile(ci, (1, PK)))
    slab = put(slab, "CJ", cj.reshape(NQ, PKW))
    sel = (jnp.arange(LANE)[None, :] // GT_HIDDEN
           == (jnp.arange(N * O) % PK)[:, None]).astype(jnp.float32)
    slab = put(slab, "SEL", sel)
    slab = put(slab, "GW2", jnp.kron(jnp.eye(PK, dtype=jnp.float32), p['g_w2']))
    slab = put(slab, "GW3", jnp.kron(jnp.eye(PK, dtype=jnp.float32), p['g_w3']))
    slab = put(slab, "FW1", jnp.tile(p['f_w1'], (PK, 1)))     # stacked copies fold the pair-sum
    slab = put(slab, "FW2", p['f_w2'])
    slab = put(slab, "FW3", jnp.pad(p['f_w3'], ((0, 0), (0, LANE - A_SIZE))))
    biases = jnp.concatenate([
        jnp.tile(p['g_b2'], (1, PK)),
        jnp.tile(p['g_b3'], (1, PK)),
        jnp.pad(p['f_b1'], ((0, 0), (0, LANE - FP_HIDDEN))),
        jnp.pad(p['f_b2'], ((0, 0), (0, LANE - FP_HIDDEN))),
        jnp.pad(p['f_b3'], ((0, 0), (0, LANE - A_SIZE))),
    ], axis=0)
    slab = put(slab, "B", biases)
    return slab


def pack_activations(patches, code):
    """Patches (+ ones-lane carrying conv bias) and question code (+ ones-lane carrying
    g_b1) in ONE activation slab => a single input DMA."""
    act = jnp.zeros((ACT_ROWS, K_PAD), jnp.float32)
    act = act.at[:N * O, :K_COL].set(patches)
    act = act.at[:N * O, K_COL].set(1.0)
    act = act.at[N * O:N * O + N, :TE_HIDDEN].set(code)
    act = act.at[N * O:N * O + N, TE_HIDDEN].set(1.0)
    return act


# ------------------------------ forward wrapper -------------------------------
def relational_network_forward(image, question, question_length, p, pslab):
    patches = im2col(image).reshape(N * O, K_COL)                       # glue (tiny XLA work)
    code = text_encode(question, question_length, p)                    # glue (stand-in RNN)
    act = pack_activations(patches, code)

    logits_pad = pl.pallas_call(
        _fused_rn_kernel,
        out_shape=jax.ShapeDtypeStruct((N, LANE), jnp.float32),
        in_specs=[pl.BlockSpec(memory_space=pltpu.MemorySpace.VMEM),
                  pl.BlockSpec(memory_space=pltpu.MemorySpace.VMEM)],
        out_specs=pl.BlockSpec(memory_space=pltpu.MemorySpace.VMEM),
    )(act, pslab)

    # torch's .squeeze() only matters for n == 1; batch > 1 here so it is a no-op.
    return logits_pad[:, :A_SIZE]


# --------------------------- deterministic parameters -------------------------
def init_params(key):
    ks = jax.random.split(key, 16)

    def linear(kw, kb, fan_in, fan_out):
        bound = 1.0 / np.sqrt(fan_in)
        w = jax.random.uniform(kw, (fan_in, fan_out), jnp.float32, -bound, bound)
        b = jax.random.uniform(kb, (1, fan_out), jnp.float32, -bound, bound)
        return w, b

    p = {}
    # visual encoder Conv2d(C_IN, CV_FILTER, 3, 2, padding=1) with kaiming_uniform_
    bound = np.sqrt(6.0 / K_COL)
    p['w_conv'] = jax.random.uniform(ks[0], (K_COL, CV_FILTER), jnp.float32, -bound, bound)
    p['b_conv'] = jnp.zeros((1, CV_FILTER), jnp.float32)
    # text encoder stand-in
    p['emb'] = jax.random.normal(ks[1], (VOCAB, TE_HIDDEN), jnp.float32) * 0.1
    p['w_txt'], p['b_txt'] = linear(ks[2], ks[3], TE_HIDDEN, TE_HIDDEN)
    # g_theta: MLP((cv_filter+2)*2 + te_hidden, gt_hidden, gt_hidden, 3)
    p['g_w1'], p['g_b1'] = linear(ks[4], ks[5], PAIR_DIM, GT_HIDDEN)
    p['g_w2'], p['g_b2'] = linear(ks[6], ks[7], GT_HIDDEN, GT_HIDDEN)
    p['g_w3'], p['g_b3'] = linear(ks[8], ks[9], GT_HIDDEN, GT_HIDDEN)
    # f_phi: MLP(gt_hidden, fp_hidden, a_size, 3, dropout, last=True)
    p['f_w1'], p['f_b1'] = linear(ks[10], ks[11], GT_HIDDEN, FP_HIDDEN)
    p['f_w2'], p['f_b2'] = linear(ks[12], ks[13], FP_HIDDEN, FP_HIDDEN)
    p['f_w3'], p['f_b3'] = linear(ks[14], ks[15], FP_HIDDEN, A_SIZE)
    return p


# ------------------------------ pure-JAX reference -----------------------------
def reference_forward(image, question, question_length, p):
    patches = im2col(image)
    x = jnp.maximum((patches @ p['w_conv'] + p['b_conv']) * BN_SCALE, 0.0)
    code = text_encode(question, question_length, p)
    coords = jnp.broadcast_to(_coords()[None], (N, O, 2))
    feats = jnp.concatenate([x, coords], axis=2)                        # (N, O, FEAT)
    img1 = jnp.broadcast_to(feats[:, None, :, :], (N, O, O, FEAT))      # feats[j]
    img2 = jnp.broadcast_to(feats[:, :, None, :], (N, O, O, FEAT))      # feats[i]
    q = jnp.broadcast_to(code[:, None, None, :], (N, O, O, TE_HIDDEN))
    pairs = jnp.concatenate([img1, img2, q], axis=3).reshape(N, O * O, PAIR_DIM)
    h = jnp.maximum(pairs @ p['g_w1'] + p['g_b1'], 0.0)
    h = jnp.maximum(h @ p['g_w2'] + p['g_b2'], 0.0)
    h = jnp.maximum(h @ p['g_w3'] + p['g_b3'], 0.0)
    rel = h.sum(1)
    h = jnp.maximum(rel @ p['f_w1'] + p['f_b1'], 0.0)
    h = jnp.maximum(h @ p['f_w2'] + p['f_b2'], 0.0)
    return h @ p['f_w3'] + p['f_b3']


if __name__ == "__main__":
    key = jax.random.PRNGKey(0)
    kp, ki, kq = jax.random.split(key, 3)
    params = init_params(kp)
    pslab = pack_params(params)        # packed ONCE (analogous to module weights)

    image = jax.random.normal(ki, (N, C_IN, H_IN, W_IN), jnp.float32)   # NCHW
    question = jax.random.randint(kq, (N, SEQ), 0, VOCAB)
    question_length = jnp.array([SEQ, SEQ - 3], jnp.int32)

    fwd = jax.jit(relational_network_forward)
    logits = jax.block_until_ready(fwd(image, question, question_length, params, pslab))
    ref = reference_forward(image, question, question_length, params)
    np.testing.assert_allclose(np.asarray(logits), np.asarray(ref), rtol=1e-4, atol=1e-4)
    print("KERNEL_OK")
</pallas_src>

<mosaic_0001>
module attributes {stable_mosaic.version = 11 : i64} {
  func.func @_fused_rn_kernel(%arg0: memref<40x80xf32, #tpu.memory_space<vmem>>, %arg1: memref<640x128xf32, #tpu.memory_space<vmem>>, %arg2: memref<2x128xf32, #tpu.memory_space<vmem>>) attributes {dimension_semantics = [], scalar_prefetch = 0 : i64, scratch_operands = 0 : i64, tpu.core_type = #tpu.core_type<tc>} {
    %c0 = arith.constant 0 : index
    %c0_0 = arith.constant 0 : index
    %0 = vector.load %arg0[%c0, %c0_0] : memref<40x80xf32, #tpu.memory_space<vmem>>, vector<32x80xf32>
    %c0_1 = arith.constant 0 : index
    %c0_2 = arith.constant 0 : index
    %1 = vector.load %arg1[%c0_1, %c0_2] : memref<640x128xf32, #tpu.memory_space<vmem>>, vector<80x4xf32>
    %cst = arith.constant dense<0.000000e+00> : vector<32x4xf32>
    %2 = tpu.matmul %0, %1, %cst {dimension_numbers = #tpu.dot_dimension_numbers<[1], [0], [0], [1], [0, 0, 1, 1], [], []>} : vector<32x80xf32>, vector<80x4xf32>, vector<32x4xf32> -> vector<32x4xf32>
    %cst_3 = arith.constant 0.000000e+00 : f32
    %3 = vector.broadcast %cst_3 : f32 to vector<32x4xf32>
    %4 = arith.maximumf %2, %3 : vector<32x4xf32>
    %c32 = arith.constant 32 : index
    %c0_4 = arith.constant 0 : index
    %5 = vector.load %arg0[%c32, %c0_4] : memref<40x80xf32, #tpu.memory_space<vmem>>, vector<2x32xf32>
    %c80 = arith.constant 80 : index
    %c0_5 = arith.constant 0 : index
    %6 = vector.load %arg1[%c80, %c0_5] : memref<640x128xf32, #tpu.memory_space<vmem>>, vector<32x128xf32>
    %cst_6 = arith.constant dense<0.000000e+00> : vector<2x128xf32>
    %7 = tpu.matmul %5, %6, %cst_6 {dimension_numbers = #tpu.dot_dimension_numbers<[1], [0], [0], [1], [0, 0, 1, 1], [], []>} : vector<2x32xf32>, vector<32x128xf32>, vector<2x128xf32> -> vector<2x128xf32>
    %c112 = arith.constant 112 : index
    %c0_7 = arith.constant 0 : index
    %8 = vector.load %arg1[%c112, %c0_7] : memref<640x128xf32, #tpu.memory_space<vmem>>, vector<4x128xf32>
    %cst_8 = arith.constant dense<0.000000e+00> : vector<32x128xf32>
    %9 = tpu.matmul %4, %8, %cst_8 {dimension_numbers = #tpu.dot_dimension_numbers<[1], [0], [0], [1], [0, 0, 1, 1], [], []>} : vector<32x4xf32>, vector<4x128xf32>, vector<32x128xf32> -> vector<32x128xf32>
    %10 = vector.shape_cast %9 : vector<32x128xf32> to vector<2x16x128xf32>
    %c128 = arith.constant 128 : index
    %c0_9 = arith.constant 0 : index
    %11 = vector.load %arg1[%c128, %c0_9] : memref<640x128xf32, #tpu.memory_space<vmem>>, vector<16x128xf32>
    %12 = vector.shape_cast %11 : vector<16x128xf32> to vector<1x16x128xf32>
    %13 = vector.broadcast %12 : vector<1x16x128xf32> to vector<2x16x128xf32>
    %14 = arith.addf %10, %13 : vector<2x16x128xf32>
    %15 = vector.shape_cast %7 : vector<2x128xf32> to vector<2x1x128xf32>
    %16 = vector.broadcast %15 : vector<2x1x128xf32> to vector<2x16x128xf32>
    %17 = arith.addf %14, %16 : vector<2x16x128xf32>
    %c120 = arith.constant 120 : index
    %c0_10 = arith.constant 0 : index
    %18 = vector.load %arg1[%c120, %c0_10] : memref<640x128xf32, #tpu.memory_space<vmem>>, vector<4x128xf32>
    %cst_11 = arith.constant dense<0.000000e+00> : vector<32x128xf32>
    %19 = tpu.matmul %4, %18, %cst_11 {dimension_numbers = #tpu.dot_dimension_numbers<[1], [0], [0], [1], [0, 0, 1, 1], [], []>} : vector<32x4xf32>, vector<4x128xf32>, vector<32x128xf32> -> vector<32x128xf32>
    %c152 = arith.constant 152 : index
    %c0_12 = arith.constant 0 : index
    %20 = vector.load %arg1[%c152, %c0_12] : memref<640x128xf32, #tpu.memory_space<vmem>>, vector<32x128xf32>
    %21 = arith.mulf %19, %20 : vector<32x128xf32>
    %22 = vector.shape_cast %21 : vector<32x128xf32> to vector<8x4x128xf32>
    %cst_13 = arith.constant dense<0.000000e+00> : vector<8x128xf32>
    %23 = vector.multi_reduction <add>, %22, %cst_13 [1] : vector<8x4x128xf32> to vector<8x128xf32>
    %24 = vector.shape_cast %23 : vector<8x128xf32> to vector<2x4x128xf32>
    %c144 = arith.constant 144 : index
    %c0_14 = arith.constant 0 : index
    %25 = vector.load %arg1[%c144, %c0_14] : memref<640x128xf32, #tpu.memory_space<vmem>>, vector<4x128xf32>
    %26 = vector.shape_cast %25 : vector<4x128xf32> to vector<1x4x128xf32>
    %27 = vector.broadcast %26 : vector<1x4x128xf32> to vector<2x4x128xf32>
    %28 = arith.addf %24, %27 : vector<2x4x128xf32>
    %29 = vector.shape_cast %17 : vector<2x16x128xf32> to vector<2x16x1x128xf32>
    %30 = vector.shape_cast %28 : vector<2x4x128xf32> to vector<2x1x4x128xf32>
    %31 = vector.broadcast %29 : vector<2x16x1x128xf32> to vector<2x16x4x128xf32>
    %32 = vector.broadcast %30 : vector<2x1x4x128xf32> to vector<2x16x4x128xf32>
    %33 = arith.addf %31, %32 : vector<2x16x4x128xf32>
    %cst_15 = arith.constant 0.000000e+00 : f32
    %34 = vector.broadcast %cst_15 : f32 to vector<2x16x4x128xf32>
    %35 = arith.maximumf %33, %34 : vector<2x16x4x128xf32>
    %36 = vector.shape_cast %35 : vector<2x16x4x128xf32> to vector<128x128xf32>
    %c184 = arith.constant 184 : index
    %c0_16 = arith.constant 0 : index
    %37 = vector.load %arg1[%c184, %c0_16] : memref<640x128xf32, #tpu.memory_space<vmem>>, vector<128x128xf32>
    %cst_17 = arith.constant dense<0.000000e+00> : vector<128x128xf32>
    %38 = tpu.matmul %36, %37, %cst_17 {dimension_numbers = #tpu.dot_dimension_numbers<[1], [0], [0], [1], [0, 0, 1, 1], [], []>} : vector<128x128xf32>, vector<128x128xf32>, vector<128x128xf32> -> vector<128x128xf32>
    %c632 = arith.constant 632 : index
    %c0_18 = arith.constant 0 : index
    %39 = vector.load %arg1[%c632, %c0_18] : memref<640x128xf32, #tpu.memory_space<vmem>>, vector<1x128xf32>
    %40 = vector.broadcast %39 : vector<1x128xf32> to vector<128x128xf32>
    %41 = arith.addf %38, %40 : vector<128x128xf32>
    %cst_19 = arith.constant 0.000000e+00 : f32
    %42 = vector.broadcast %cst_19 : f32 to vector<128x128xf32>
    %43 = arith.maximumf %41, %42 : vector<128x128xf32>
    %c312 = arith.constant 312 : index
    %c0_20 = arith.constant 0 : index
    %44 = vector.load %arg1[%c312, %c0_20] : memref<640x128xf32, #tpu.memory_space<vmem>>, vector<128x128xf32>
    %cst_21 = arith.constant dense<0.000000e+00> : vector<128x128xf32>
    %45 = tpu.matmul %43, %44, %cst_21 {dimension_numbers = #tpu.dot_dimension_numbers<[1], [0], [0], [1], [0, 0, 1, 1], [], []>} : vector<128x128xf32>, vector<128x128xf32>, vector<128x128xf32> -> vector<128x128xf32>
    %c633 = arith.constant 633 : index
    %c0_22 = arith.constant 0 : index
    %46 = vector.load %arg1[%c633, %c0_22] : memref<640x128xf32, #tpu.memory_space<vmem>>, vector<1x128xf32>
    %47 = vector.broadcast %46 : vector<1x128xf32> to vector<128x128xf32>
    %48 = arith.addf %45, %47 : vector<128x128xf32>
    %cst_23 = arith.constant 0.000000e+00 : f32
    %49 = vector.broadcast %cst_23 : f32 to vector<128x128xf32>
    %50 = arith.maximumf %48, %49 : vector<128x128xf32>
    %51 = vector.shape_cast %50 : vector<128x128xf32> to vector<2x64x128xf32>
    %cst_24 = arith.constant dense<0.000000e+00> : vector<2x128xf32>
    %52 = vector.multi_reduction <add>, %51, %cst_24 [1] : vector<2x64x128xf32> to vector<2x128xf32>
    %c440 = arith.constant 440 : index
    %c0_25 = arith.constant 0 : index
    %53 = vector.load %arg1[%c440, %c0_25] : memref<640x128xf32, #tpu.memory_space<vmem>>, vector<128x32xf32>
    %cst_26 = arith.constant dense<0.000000e+00> : vector<2x32xf32>
    %54 = tpu.matmul %52, %53, %cst_26 {dimension_numbers = #tpu.dot_dimension_numbers<[1], [0], [0], [1], [0, 0, 1, 1], [], []>} : vector<2x128xf32>, vector<128x32xf32>, vector<2x32xf32> -> vector<2x32xf32>
    %c634 = arith.constant 634 : index
    %c0_27 = arith.constant 0 : index
    %55 = vector.load %arg1[%c634, %c0_27] : memref<640x128xf32, #tpu.memory_space<vmem>>, vector<1x32xf32>
    %56 = vector.broadcast %55 : vector<1x32xf32> to vector<2x32xf32>
    %57 = arith.addf %54, %56 : vector<2x32xf32>
    %cst_28 = arith.constant 0.000000e+00 : f32
    %58 = vector.broadcast %cst_28 : f32 to vector<2x32xf32>
    %59 = arith.maximumf %57, %58 : vector<2x32xf32>
    %c568 = arith.constant 568 : index
    %c0_29 = arith.constant 0 : index
    %60 = vector.load %arg1[%c568, %c0_29] : memref<640x128xf32, #tpu.memory_space<vmem>>, vector<32x32xf32>
    %cst_30 = arith.constant dense<0.000000e+00> : vector<2x32xf32>
    %61 = tpu.matmul %59, %60, %cst_30 {dimension_numbers = #tpu.dot_dimension_numbers<[1], [0], [0], [1], [0, 0, 1, 1], [], []>} : vector<2x32xf32>, vector<32x32xf32>, vector<2x32xf32> -> vector<2x32xf32>
    %c635 = arith.constant 635 : index
    %c0_31 = arith.constant 0 : index
    %62 = vector.load %arg1[%c635, %c0_31] : memref<640x128xf32, #tpu.memory_space<vmem>>, vector<1x32xf32>
    %63 = vector.broadcast %62 : vector<1x32xf32> to vector<2x32xf32>
    %64 = arith.addf %61, %63 : vector<2x32xf32>
    %cst_32 = arith.constant 0.000000e+00 : f32
    %65 = vector.broadcast %cst_32 : f32 to vector<2x32xf32>
    %66 = arith.maximumf %64, %65 : vector<2x32xf32>
    %c600 = arith.constant 600 : index
    %c0_33 = arith.constant 0 : index
    %67 = vector.load %arg1[%c600, %c0_33] : memref<640x128xf32, #tpu.memory_space<vmem>>, vector<32x128xf32>
    %cst_34 = arith.constant dense<0.000000e+00> : vector<2x128xf32>
    %68 = tpu.matmul %66, %67, %cst_34 {dimension_numbers = #tpu.dot_dimension_numbers<[1], [0], [0], [1], [0, 0, 1, 1], [], []>} : vector<2x32xf32>, vector<32x128xf32>, vector<2x128xf32> -> vector<2x128xf32>
    %c636 = arith.constant 636 : index
    %c0_35 = arith.constant 0 : index
    %69 = vector.load %arg1[%c636, %c0_35] : memref<640x128xf32, #tpu.memory_space<vmem>>, vector<1x128xf32>
    %70 = vector.broadcast %69 : vector<1x128xf32> to vector<2x128xf32>
    %71 = arith.addf %68, %70 : vector<2x128xf32>
    %c0_36 = arith.constant 0 : index
    %c0_37 = arith.constant 0 : index
    %72 = vector.load %arg2[%c0_36, %c0_37] : memref<2x128xf32, #tpu.memory_space<vmem>>, vector<2x128xf32>
    tpu.vector_store %arg2[%c0_36, %c0_37], %71 {strides = array<i32>} : memref<2x128xf32, #tpu.memory_space<vmem>>, vector<2x128xf32>,
    return
  }
}

</mosaic_0001>

<bundles_post_ra>
// kernel: relational_network_forward.1
= control target key start
LH: loop header
LB: loop body
LE: loop exit
PB: predicated region body
PF: predicated region fallthrough
CT: control target
= control target key end

     0   :  { %s1497_s0 = inlined_call_operand.vmem [shape: f32[40,80], index: 0, kind: input, shape index: {}]   ;;  %s1498_s1 = inlined_call_operand.vmem [shape: f32[640,128], index: 1, kind: input, shape index: {}]   ;;  %s1499_s2 = inlined_call_operand.hbm [shape: f32[2,128], index: 2, kind: output, shape index: {}]  }
   0x1   :  { %v25_v0 = vld [vmem:[%s1498_s1 + $0x48] sm:$0xff]  ;;  %v24_v1 = vld [vmem:[%s1498_s1 + $0x40] sm:$0xff]  ;;  %v23_v2 = vld [vmem:[%s1498_s1 + $0x38] sm:$0xff] }
   0x2   :  { %45 = vmatpush.msra.mxu0 %v25_v0  ;;  %v22_v3 = vld [vmem:[%s1498_s1 + $0x30] sm:$0xff]  ;;  %v21_v4 = vld [vmem:[%s1498_s1 + $0x28] sm:$0xff] }
   0x4   :  { %46 = vmatpush.msra.mxu0 %v24_v1 }
   0x6   :  { %47 = vmatpush.msra.mxu0 %v23_v2 }
   0x7   :  { %7 = vsyncpa [#allocation3], 0  ;;  %v20_v5 = vld [vmem:[%s1498_s1 + $0x20] sm:$0xff]  ;;  %v19_v6 = vld [vmem:[%s1498_s1 + $0x18] sm:$0xff]  ;;  %vm26_vm0 = vcmask 654336   ;;  %vm77_vm1 = vcmask 261120  }
   0x8   :  { %48 = vmatpush.msra.mxu0 %v22_v3  ;;  %v18_v7 = vld [vmem:[%s1498_s1 + $0x10] sm:$0xff]  ;;  %v76_v8 = vld [vmem:[%s1498_s1 + $0x68] sm:$0xff]  ;;  %v75_v9 = vld [vmem:[%s1498_s1 + $0x60] sm:$0xff]  ;;  %vm115_vm2 = vcmask 1043456   ;;  %vm102_vm3 = vcmask 31744   ;;  %vm395_vm4 = vcmask 1041409  }
   0x9   :  { %93 = vmatpush.msra.mxu1 %v76_v8  ;;  %v17_v10 = vld [vmem:[%s1498_s1 + $0x8] sm:$0xff]  ;;  %v74_v11 = vld [vmem:[%s1498_s1 + $0x58] sm:$0xff]  ;;  %v16_v12 = vld [vmem:[%s1498_s1] sm:$0xff]  ;;  %vm398_vm5 = vcmask 1042434   ;;  %vm401_vm6 = vcmask 1043459   ;;  %s1002_s14 = smov [#allocation2]  }
   0xa   :  { %49 = vmatpush.msra.mxu0 %v21_v4  ;;  %v73_v13 = vld [vmem:[%s1498_s1 + $0x50] sm:$0xff]  ;;  %v12_v14 = vld [vmem:[%s1497_s0] sm:$0xff]  ;;  %v13_v16 = vld [vmem:[%s1497_s0 + $0x8] sm:$0xff]  ;;  %s910_s15 = sshll.u32 %s1002_s14, 4  ;;  %s912_s18 = sshll.u32 %s1499_s2, 4  ;;  %s911_s15 = int_to_ptr.vmem [resolvable:$true] %s910_s15  ;;  %s913_s18 = int_to_ptr.hbm [resolvable:$true] %s912_s18 }
   0xb   :  { %94 = vmatpush.msra.mxu1 %v75_v9  ;;  %v72_v15 = vld [vmem:[%s1497_s0 + $0x20] sm:$0x3]  ;;  %v14_v17 = vld [vmem:[%s1497_s0 + $0x10] sm:$0xff]  ;;  %v15_v18 = vld [vmem:[%s1497_s0 + $0x18] sm:$0xff] }
   0xc   :  { %50 = vmatpush.msra.mxu0 %v20_v5  ;;  %v101_v19 = vld [vmem:[%s1498_s1 + $0x70] sm:$0xf]  ;;  %v164_v20 = vld [vmem:[%s1498_s1 + $0x78] sm:$0xf]  ;;  %v489_v30 = vld [vmem:[%s1498_s1 + $0x128] sm:$0xff] }
   0xd   :  { %95 = vmatpush.msra.mxu1 %v74_v11  ;;  %931 = vmatpush.msk.msra.mxu3 %vm115_vm2, %v164_v20  ;;  %v490_v29 = vld [vmem:[%s1498_s1 + $0x130] sm:$0xff]  ;;  %v488_v32 = vld [vmem:[%s1498_s1 + $0x120] sm:$0xff]  ;;  %v487_v33 = vld [vmem:[%s1498_s1 + $0x118] sm:$0xff] }
   0xe   :  { %51 = vmatpush.msra.mxu0 %v19_v6  ;;  %938 = vmatpush.msra.mxu2 %v490_v29  ;;  %v486_v34 = vld [vmem:[%s1498_s1 + $0x110] sm:$0xff]  ;;  %v485_v35 = vld [vmem:[%s1498_s1 + $0x108] sm:$0xff]  ;;  %v484_v36 = vld [vmem:[%s1498_s1 + $0x100] sm:$0xff] }
   0xf   :  { %96 = vmatpush.msra.mxu1 %v73_v13  ;;  %v483_v38 = vld [vmem:[%s1498_s1 + $0xf8] sm:$0xff]  ;;  %v1113_v39 = vld [vmem:[%s1498_s1 + $0x80] sm:$0xff]  ;;  %v482_v40 = vld [vmem:[%s1498_s1 + $0xf0] sm:$0xff] }
  0x10   :  { %52 = vmatpush.msra.mxu0 %v18_v7  ;;  %925 = vmatmul.msk.f32.vlgmr.msra.gmra.mxu1 %vm77_vm1, %v72_v15  ;;  %v197_v41 = vld [vmem:[%s1498_s1 + $0x98] sm:$0xff]  ;;  %v481_v42 = vld [vmem:[%s1498_s1 + $0xe8] sm:$0xff]  ;;  %v480_v46 = vld [vmem:[%s1498_s1 + $0xe0] sm:$0xff] }
  0x11   :  { %926 = vmatpush.msk.msrb.mxu1 %vm115_vm2, %v101_v19  ;;  %939 = vmatpush.msra.mxu2 %v489_v30  ;;  %v479_v48 = vld [vmem:[%s1498_s1 + $0xd8] sm:$0xff]  ;;  %v1139_v54 = vld [vmem:[%s1498_s1 + $0x88] sm:$0xff]  ;;  %v1144_v56 = vld [vmem:[%s1498_s1 + $0x90] sm:$0xf] }
  0x12   :  { %53 = vmatpush.msra.mxu0 %v17_v10  ;;  %v478_v57 = vld [vmem:[%s1498_s1 + $0xd0] sm:$0xff]  ;;  %v198_v62 = vld [vmem:[%s1498_s1 + $0xa0] sm:$0xff]  ;;  %v477_v63 = vld [vmem:[%s1498_s1 + $0xc8] sm:$0xff]  ;;  %v275_v2 = vrot.slane %v1144_v56, 1  ;;  %v276_v3 = vrot.slane %v1144_v56, 2  ;;  %v277_v8 = vrot.slane %v1144_v56, 3 }
  0x13   :  { %596 = vmatpush.msra.mxu1 %v490_v29  ;;  %940 = vmatpush.msra.mxu2 %v488_v32  ;;  %v476_v9 = vld [vmem:[%s1498_s1 + $0xc0] sm:$0xff] }
  0x14   :  { %54 = vmatpush.msra.mxu0 %v16_v12 }
  0x15   :  { %921 = vmatmul.msk.f32.vlgmr.msra.gmra.mxu0 %vm26_vm0, %v12_v14  ;;  %597 = vmatpush.msra.mxu1 %v489_v30 }
  0x16   :  { %941 = vmatpush.msra.mxu2 %v487_v33 }
  0x17   :  { %598 = vmatpush.msra.mxu1 %v488_v32 }
  0x18   :  { %942 = vmatpush.msra.mxu2 %v486_v34 }
  0x19   :  { %599 = vmatpush.msra.mxu1 %v487_v33 }
  0x1a   :  { %943 = vmatpush.msra.mxu2 %v485_v35 }
  0x1b   :  { %600 = vmatpush.msra.mxu1 %v486_v34  ;;  %v199_v34 = vld [vmem:[%s1498_s1 + $0xa8] sm:$0xff] }
  0x1c   :  { %944 = vmatpush.msra.mxu2 %v484_v36 }
  0x1d   :  { %922 = vmatmul.msk.f32.gmra.mxu0 %vm26_vm0, %v13_v16  ;;  %601 = vmatpush.msra.mxu1 %v485_v35 }
  0x1e   :  { %945 = vmatpush.msra.mxu2 %v483_v38 }
  0x1f   :  { %602 = vmatpush.msra.mxu1 %v484_v36 }
  0x20   :  { %946 = vmatpush.msra.mxu2 %v482_v40 }
  0x21   :  { %603 = vmatpush.msra.mxu1 %v483_v38 }
  0x22   :  { %947 = vmatpush.msra.mxu2 %v481_v42 }
  0x23   :  { %604 = vmatpush.msra.mxu1 %v482_v40 }
  0x24   :  { %948 = vmatpush.msra.mxu2 %v480_v46 }
  0x25   :  { %923 = vmatmul.msk.f32.gmra.mxu0 %vm26_vm0, %v14_v17  ;;  %605 = vmatpush.msra.mxu1 %v481_v42  ;;  %v475_v17 = vld [vmem:[%s1498_s1 + $0xb8] sm:$0xff] }
  0x26   :  { %949 = vmatpush.msra.mxu2 %v479_v48 }
  0x27   :  { %606 = vmatpush.msra.mxu1 %v480_v46 }
  0x28   :  { %950 = vmatpush.msra.mxu2 %v478_v57 }
  0x29   :  { %607 = vmatpush.msra.mxu1 %v479_v48 }
  0x2a   :  { %951 = vmatpush.msra.mxu2 %v477_v63 }
  0x2b   :  { %608 = vmatpush.msra.mxu1 %v478_v57 }
  0x2c   :  { %952 = vmatpush.msra.mxu2 %v476_v9 }
  0x2d   :  { %924 = vmatmul.msk.f32.gmra.mxu0 %vm26_vm0, %v15_v18  ;;  %609 = vmatpush.msra.mxu1 %v477_v63 }
  0x2e   :  { %953 = vmatpush.msra.mxu2 %v475_v17 }
  0x2f   :  { %610 = vmatpush.msra.mxu1 %v476_v9 }
  0x31   :  { %611 = vmatpush.msra.mxu1 %v475_v17 }
  0x8d   :  { %v1090_v31 = vpop.f32.mrf.mxu1 }
  0x8e   :  { %v156_v43 = vperm.slane %v1090_v31, 0  ;;  %v155_v49 = vrot.slane %v1090_v31, 1 }
  0x90   :  { %v1157_v0 = vperm.slane %v155_v49, 0 }
  0x92   :  { %v56_v21 = vpop.f32.mrf.mxu0 }
  0x93   :  { %v68_v22 = vmax.f32 %v56_v21, 0.0 }
  0x95   :  { %927 = vmatmul.msk.f32.vlgmr.msrb.gmra.mxu1 %vm102_vm3, %v68_v22  ;;  %932 = vmatmul.msk.f32.vlgmr.msra.gmra.mxu3 %vm102_vm3, %v68_v22 }
  0x9a   :  { %v59_v23 = vpop.f32.mrf.mxu0 }
  0x9b   :  { %v69_v24 = vmax.f32 %v59_v23, 0.0 }
  0x9d   :  { %928 = vmatmul.msk.f32.gmra.mxu1 %vm102_vm3, %v69_v24  ;;  %933 = vmatmul.msk.f32.gmra.mxu3 %vm102_vm3, %v69_v24 }
  0xa2   :  { %v62_v25 = vpop.f32.mrf.mxu0 }
  0xa3   :  { %v70_v26 = vmax.f32 %v62_v25, 0.0 }
  0xa5   :  { %929 = vmatmul.msk.f32.gmra.mxu1 %vm102_vm3, %v70_v26  ;;  %934 = vmatmul.msk.f32.gmra.mxu3 %vm102_vm3, %v70_v26 }
  0xaa   :  { %v65_v27 = vpop.f32.mrf.mxu0 }
  0xab   :  { %v71_v28 = vmax.f32 %v65_v27, 0.0 }
  0xad   :  { %930 = vmatmul.msk.f32.gmra.mxu1 %vm102_vm3, %v71_v28  ;;  %935 = vmatmul.msk.f32.gmra.mxu3 %vm102_vm3, %v71_v28 }
 0x112   :  { %v136_v37 = vpop.f32.mrf.mxu1 }
 0x113   :  { %v150_v44 = vadd.f32 %v1113_v39, %v136_v37 }
 0x115   :  { %v1133_v50 = vadd.f32 %v156_v43, %v150_v44 }
 0x117   :  { %v294_v1 = vrot.slane %v1133_v50, 1  ;;  %v295_v4 = vrot.slane %v1133_v50, 2  ;;  %v296_v5 = vrot.slane %v1133_v50, 3  ;;  %v297_v12 = vrot.slane %v1133_v50, 4 }
 0x118   :  { %v185_v45 = vpop.f32.mrf.mxu3  ;;  %v298_v13 = vrot.slane %v1133_v50, 5  ;;  %v322_v14 = vperm.slane %v1133_v50, 0  ;;  %v299_v18 = vrot.slane %v1133_v50, 6  ;;  %v300_v22 = vrot.slane %v1133_v50, 7 }
 0x119   :  { %v201_v47 = vmul.f32 %v197_v41, %v185_v45  ;;  %v1177_v19 = vperm.slane %v294_v1, 0  ;;  %v1181_v23 = vperm.slane %v295_v4, 0  ;;  %v1183_v24 = vperm.slane %v296_v5, 0 }
 0x11a   :  { %v139_v53 = vpop.f32.mrf.mxu1  ;;  %v1186_v29 = vperm.slane %v297_v12, 0  ;;  %v1188_v30 = vperm.slane %v298_v13, 0  ;;  %v1196_v38 = vperm.slane %v299_v18, 0  ;;  %v1198_v40 = vperm.slane %v300_v22, 0  ;;  %v200_v12 = vld [vmem:[%s1498_s1 + $0xb0] sm:$0xff] }
 0x11b   :  { %v209_v51 = vrot.slane %v201_v47, 4  ;;  %v217_v52 = vsel %vm115_vm2, %v201_v47, 0.0  ;;  %v151_v61 = vadd.f32 %v1139_v54, %v139_v53 }
 0x11c   :  { %v218_v55 = vrot.slane %v217_v52, 4 }
 0x11d   :  { %v224_v58 = vsel %vm115_vm2, %v209_v51, 0.0  ;;  %v1171_v16 = vadd.f32 %v156_v43, %v151_v61 }
 0x11e   :  { %v219_v59 = vadd.f32 %v218_v55, %v217_v52  ;;  %v225_v60 = vrot.slane %v224_v58, 4 }
 0x11f   :  { %v304_v35 = vrot.slane %v1171_v16, 4  ;;  %v305_v36 = vrot.slane %v1171_v16, 5  ;;  %v306_v37 = vrot.slane %v1171_v16, 6  ;;  %v307_v46 = vrot.slane %v1171_v16, 7 }
 0x120   :  { %v226_v6 = vadd.f32 %v225_v60, %v224_v58  ;;  %v188_v7 = vpop.f32.mrf.mxu3  ;;  %v220_v10 = vrot.slane %v219_v59, 2  ;;  %v301_v51 = vrot.slane %v1171_v16, 1  ;;  %v330_v57 = vperm.slane %v1171_v16, 0 }
 0x121   :  { %v202_v11 = vmul.f32 %v198_v62, %v188_v7  ;;  %v1203_v55 = vperm.slane %v304_v35, 0  ;;  %v1209_v61 = vperm.slane %v305_v36, 0  ;;  %v302_v1 = vrot.slane %v1171_v16, 2 }
 0x122   :  { %v227_v15 = vrot.slane %v226_v6, 2  ;;  %v221_v27 = vadd.f32 %v220_v10, %v219_v59  ;;  %v142_v44 = vpop.f32.mrf.mxu1  ;;  %v1216_v7 = vperm.slane %v306_v37, 0  ;;  %v1221_v13 = vperm.slane %v307_v46, 0 }
 0x123   :  { %v210_v20 = vrot.slane %v202_v11, 4  ;;  %v231_v21 = vsel %vm115_vm2, %v202_v11, 0.0  ;;  %v152_v48 = vadd.f32 %v1113_v39, %v142_v44  ;;  %v1223_v18 = vperm.slane %v301_v51, 0 }
 0x124   :  { %v228_v25 = vadd.f32 %v227_v15, %v226_v6  ;;  %v232_v26 = vrot.slane %v231_v21, 4  ;;  %v222_v47 = vrot.slane %v221_v27, 1 }
 0x125   :  { %v238_v28 = vsel %vm115_vm2, %v210_v20, 0.0  ;;  %v1213_v5 = vadd.f32 %v1157_v0, %v152_v48  ;;  %v303_v20 = vrot.slane %v1171_v16, 3 }
 0x126   :  { %v229_v31 = vrot.slane %v228_v25, 1  ;;  %v233_v32 = vadd.f32 %v232_v26, %v231_v21  ;;  %v239_v33 = vrot.slane %v238_v28, 4  ;;  %v223_v4 = vadd.f32 %v222_v47, %v221_v27 }
 0x127   :  { %v1228_v27 = vperm.slane %v302_v1, 0  ;;  %v312_v36 = vrot.slane %v1213_v5, 5  ;;  %v313_v37 = vrot.slane %v1213_v5, 6 }
 0x128   :  { %v230_v41 = vadd.f32 %v229_v31, %v228_v25  ;;  %v234_v42 = vrot.slane %v233_v32, 2  ;;  %v240_v43 = vadd.f32 %v239_v33, %v238_v28  ;;  %v191_v45 = vpop.f32.mrf.mxu3  ;;  %v282_v28 = vadd.f32 %v1144_v56, %v223_v4 }
 0x129   :  { %v203_v49 = vmul.f32 %v199_v34, %v191_v45  ;;  %v311_v33 = vrot.slane %v1213_v5, 4 }
 0x12a   :  { %v235_v52 = vadd.f32 %v234_v42, %v233_v32  ;;  %v241_v53 = vrot.slane %v240_v43, 2  ;;  %v283_v58 = vadd.f32 %v275_v2, %v230_v41 }
 0x12b   :  { %v211_v59 = vrot.slane %v203_v49, 4  ;;  %v245_v60 = vsel %vm115_vm2, %v203_v49, 0.0 }
 0x12c   :  { %v236_v62 = vrot.slane %v235_v52, 1  ;;  %v242_v39 = vadd.f32 %v241_v53, %v240_v43  ;;  %v246_v63 = vrot.slane %v245_v60, 4  ;;  %v394_v15 = vrot.slane %v283_v58, 7  ;;  %v145_v43 = vpop.f32.mrf.mxu1 }
 0x12d   :  { %v252_v6 = vsel %vm115_vm2, %v211_v59, 0.0  ;;  %v1240_v53 = vperm.slane %v311_v33, 0  ;;  %v314_v58 = vrot.slane %v1213_v5, 7 }
 0x12e   :  { %v237_v9 = vadd.f32 %v236_v62, %v235_v52  ;;  %v243_v10 = vrot.slane %v242_v39, 1  ;;  %v247_v11 = vadd.f32 %v246_v63, %v245_v60  ;;  %v253_v17 = vrot.slane %v252_v6, 4 }
 0x12f   :  { %v396_v41 = vsel %vm395_vm4, %v394_v15, %v282_v28  ;;  %v153_v60 = vadd.f32 %v1139_v54, %v145_v43 }
 0x130   :  { %v244_v21 = vadd.f32 %v243_v10, %v242_v39  ;;  %v284_v22 = vadd.f32 %v276_v3, %v237_v9  ;;  %v248_v25 = vrot.slane %v247_v11, 2  ;;  %v194_v26 = vpop.f32.mrf.mxu3  ;;  %v254_v31 = vadd.f32 %v253_v17, %v252_v6 }
 0x131   :  { %v204_v32 = vmul.f32 %v200_v12, %v194_v26 }
 0x132   :  { %v285_v34 = vadd.f32 %v277_v8, %v244_v21  ;;  %v397_v35 = vrot.slane %v284_v22, 6  ;;  %v255_v42 = vrot.slane %v254_v31, 2  ;;  %v249_v48 = vadd.f32 %v248_v25, %v247_v11 }
 0x133   :  { %v212_v44 = vrot.slane %v204_v32, 4  ;;  %v259_v45 = vsel %vm115_vm2, %v204_v32, 0.0 }
 0x134   :  { %v399_v46 = vsel %vm398_vm5, %v397_v35, %v396_v41  ;;  %v400_v47 = vrot.slane %v285_v34, 5  ;;  %v260_v49 = vrot.slane %v259_v45, 4  ;;  %v256_v51 = vadd.f32 %v255_v42, %v254_v31 }
 0x135   :  { %v266_v52 = vsel %vm115_vm2, %v212_v44, 0.0  ;;  %v250_v9 = vrot.slane %v249_v48, 1  ;;  %v1268_v35 = vperm.slane %v314_v58, 0 }
 0x136   :  { %v1244_v59 = vsel %vm401_vm6, %v400_v47, %v399_v46  ;;  %v261_v62 = vadd.f32 %v260_v49, %v259_v45  ;;  %v267_v39 = vrot.slane %v266_v52, 4  ;;  %v257_v63 = vrot.slane %v256_v51, 1 }
 0x137   :  { %v411_v1 = vadd.f32 %v1244_v59, %v322_v14  ;;  %v412_v4 = vadd.f32 %v1244_v59, %v1177_v19  ;;  %v413_v6 = vadd.f32 %v1244_v59, %v1181_v23  ;;  %v414_v12 = vadd.f32 %v1244_v59, %v1183_v24 }
 0x138   :  { %v262_v10 = vrot.slane %v261_v62, 2  ;;  %v268_v11 = vadd.f32 %v267_v39, %v266_v52  ;;  %v258_v54 = vadd.f32 %v257_v63, %v256_v51  ;;  %v415_v14 = vadd.f32 %v1244_v59, %v1186_v29 }
 0x139   :  { %v443_v15 = vmax.f32 %v411_v1, 0.0  ;;  %v444_v17 = vmax.f32 %v412_v4, 0.0  ;;  %v445_v21 = vmax.f32 %v413_v6, 0.0  ;;  %v446_v25 = vmax.f32 %v414_v12, 0.0 }
 0x13a   :  { %v263_v22 = vadd.f32 %v262_v10, %v261_v62  ;;  %v269_v50 = vrot.slane %v268_v11, 2  ;;  %v287_v19 = vadd.f32 %v275_v2, %v258_v54  ;;  %v1260_v23 = vperm.slane %v312_v36, 0 }
 0x13b   :  { %525 = vst [vmem:[#allocation1] ss:$2 sm:$0xff] %v443_v15  ;;  %v416_v26 = vadd.f32 %v1244_v59, %v1188_v30  ;;  %v1264_v24 = vperm.slane %v313_v37, 0  ;;  %v447_v32 = vmax.f32 %v415_v14, 0.0  ;;  %v417_v33 = vadd.f32 %v1244_v59, %v1196_v38 }
 0x13c   :  { %v264_v28 = vrot.slane %v263_v22, 1  ;;  %v270_v31 = vadd.f32 %v269_v50, %v268_v11  ;;  %527 = vst [vmem:[#allocation1 + $0x1] ss:$2 sm:$0xff] %v444_v17  ;;  %v251_v34 = vadd.f32 %v250_v9, %v249_v48  ;;  %v308_v2 = vrot.slane %v1213_v5, 1 }
 0x13d   :  { %529 = vst [vmem:[#allocation1 + $0x10] ss:$2 sm:$0xff] %v445_v21  ;;  %v448_v29 = vmax.f32 %v416_v26, 0.0  ;;  %v1272_v36 = vadd.f32 %v1157_v0, %v153_v60  ;;  %v418_v41 = vadd.f32 %v1244_v59, %v1198_v40  ;;  %v403_v42 = vrot.slane %v287_v19, 7 }
 0x13e   :  { %v265_v30 = vadd.f32 %v264_v28, %v263_v22  ;;  %v271_v37 = vrot.slane %v270_v31, 1  ;;  %531 = vst [vmem:[#allocation1 + $0x11] ss:$2 sm:$0xff] %v446_v25  ;;  %v449_v43 = vmax.f32 %v417_v33, 0.0  ;;  %v338_v38 = vperm.slane %v1213_v5, 0 }
 0x13f   :  { %533 = vst [vmem:[#allocation1 + $0x20] ss:$2 sm:$0xff] %v447_v32  ;;  %v419_v44 = vadd.f32 %v1244_v59, %v330_v57  ;;  %v450_v46 = vmax.f32 %v418_v41, 0.0  ;;  %v309_v47 = vrot.slane %v1213_v5, 2  ;;  %v286_v48 = vadd.f32 %v1144_v56, %v251_v34 }
 0x140   :  { %v272_v45 = vadd.f32 %v271_v37, %v270_v31  ;;  %v288_v0 = vadd.f32 %v276_v3, %v265_v30  ;;  %535 = vst [vmem:[#allocation1 + $0x21] ss:$2 sm:$0xff] %v448_v29  ;;  %v423_v40 = vadd.f32 %v1244_v59, %v1203_v55  ;;  %v420_v49 = vadd.f32 %v1244_v59, %v1223_v18 }
 0x141   :  { %537 = vst [vmem:[#allocation1 + $0x30] ss:$2 sm:$0xff] %v449_v43  ;;  %v333_v57 = vperm.slane %v303_v20, 0  ;;  %v451_v52 = vmax.f32 %v419_v44, 0.0  ;;  %v421_v58 = vadd.f32 %v1244_v59, %v1228_v27  ;;  %v404_v60 = vsel %vm395_vm4, %v403_v42, %v286_v48 }
 0x142   :  { %v289_v51 = vadd.f32 %v277_v8, %v272_v45  ;;  %v405_v3 = vrot.slane %v288_v0, 6  ;;  %539 = vst [vmem:[#allocation1 + $0x31] ss:$2 sm:$0xff] %v450_v46  ;;  %v424_v55 = vadd.f32 %v1244_v59, %v1209_v61  ;;  %v452_v39 = vmax.f32 %v420_v49, 0.0 }
 0x143   :  { %v540_v62 = vld.sshfl [vmem:[#allocation1] sm:$0xff pattern:$0x75316420]  ;;  %v422_v18 = vadd.f32 %v1244_v59, %v333_v57  ;;  %v310_v56 = vrot.slane %v1213_v5, 3  ;;  %v453_v8 = vmax.f32 %v421_v58, 0.0  ;;  %v425_v27 = vadd.f32 %v1244_v59, %v1216_v7 }
 0x144   :  { %v406_v16 = vsel %vm398_vm5, %v405_v3, %v404_v60  ;;  %v407_v20 = vrot.slane %v289_v51, 5  ;;  %612 = vmatmul.f32.vlgmr.msra.gmra.mxu1 %v540_v62  ;;  %544 = vst [vmem:[#allocation1] ss:$2 sm:$0xff] %v451_v52  ;;  %v426_v1 = vadd.f32 %v1244_v59, %v1221_v13  ;;  %v455_v6 = vmax.f32 %v423_v40, 0.0 }
 0x145   :  { %v541_v63 = vld.sshfl [vmem:[#allocation1 + $0x10] sm:$0xff pattern:$0x75316420]  ;;  %545 = vst [vmem:[#allocation1 + $0x1] ss:$2 sm:$0xff] %v452_v39  ;;  %v454_v61 = vmax.f32 %v422_v18, 0.0 }
 0x146   :  { %v1305_v4 = vsel %vm401_vm6, %v407_v20, %v406_v16  ;;  %v315_v9 = vrot.slane %v1272_v36, 1  ;;  %v339_v10 = vperm.slane %v308_v2, 0  ;;  %546 = vst [vmem:[#allocation1 + $0x10] ss:$2 sm:$0xff] %v453_v8  ;;  %v456_v11 = vmax.f32 %v424_v55, 0.0 }
 0x147   :  { %v542_v5 = vld.sshfl [vmem:[#allocation1 + $0x20] sm:$0xff pattern:$0x75316420]  ;;  %547 = vst [vmem:[#allocation1 + $0x11] ss:$2 sm:$0xff] %v454_v61  ;;  %v346_v12 = vperm.slane %v1272_v36, 0  ;;  %v427_v7 = vadd.f32 %v1305_v4, %v338_v38  ;;  %v431_v54 = vadd.f32 %v1305_v4, %v1240_v53  ;;  %v432_v22 = vadd.f32 %v1305_v4, %v1260_v23 }
 0x148   :  { %548 = vst [vmem:[#allocation1 + $0x20] ss:$2 sm:$0xff] %v455_v6  ;;  %v428_v13 = vadd.f32 %v1305_v4, %v339_v10  ;;  %v340_v59 = vperm.slane %v309_v47, 0  ;;  %v457_v15 = vmax.f32 %v425_v27, 0.0  ;;  %v458_v17 = vmax.f32 %v426_v1, 0.0  ;;  %v690_v10 = vld [vmem:[%s1498_s1 + $0x1a0] sm:$0xff] }
 0x149   :  { %549 = vst [vmem:[#allocation1 + $0x21] ss:$2 sm:$0xff] %v456_v11  ;;  %v341_v21 = vperm.slane %v310_v56, 0  ;;  %v1315_v50 = vld.sshfl [vmem:[#allocation1 + $0x30] sm:$0xff pattern:$0x75316420]  ;;  %v433_v32 = vadd.f32 %v1305_v4, %v1264_v24  ;;  %v434_v29 = vadd.f32 %v1305_v4, %v1268_v35  ;;  %v435_v44 = vadd.f32 %v1305_v4, %v346_v12 }
 0x14a   :  { %v459_v25 = vmax.f32 %v427_v7, 0.0  ;;  %v460_v14 = vmax.f32 %v428_v13, 0.0  ;;  %v429_v19 = vadd.f32 %v1305_v4, %v340_v59  ;;  %550 = vst [vmem:[#allocation1 + $0x30] ss:$2 sm:$0xff] %v457_v15  ;;  %v347_v26 = vperm.slane %v315_v9, 0  ;;  %v691_v9 = vld [vmem:[%s1498_s1 + $0x1a8] sm:$0xff] }
 0x14b   :  { %v316_v28 = vrot.slane %v1272_v36, 2  ;;  %v317_v31 = vrot.slane %v1272_v36, 3  ;;  %v430_v53 = vadd.f32 %v1305_v4, %v341_v21  ;;  %551 = vst [vmem:[#allocation1 + $0x31] ss:$2 sm:$0xff] %v458_v17  ;;  %v463_v34 = vmax.f32 %v431_v54, 0.0  ;;  %v689_v11 = vld [vmem:[%s1498_s1 + $0x198] sm:$0xff] }
 0x14c   :  { %615 = vmatmul.f32.gmra.mxu1 %v541_v63  ;;  %v552_v23 = vld.sshfl [vmem:[#allocation1] sm:$0xff pattern:$0x75316420]  ;;  %v461_v33 = vmax.f32 %v429_v19, 0.0  ;;  %v318_v30 = vrot.slane %v1272_v36, 4  ;;  %v464_v37 = vmax.f32 %v432_v22, 0.0  ;;  %v436_v45 = vadd.f32 %v1305_v4, %v347_v26 }
 0x14d   :  { %556 = vst [vmem:[#allocation1] ss:$2 sm:$0xff] %v459_v25  ;;  %v462_v2 = vmax.f32 %v430_v53, 0.0  ;;  %v348_v42 = vperm.slane %v316_v28, 0  ;;  %v319_v43 = vrot.slane %v1272_v36, 5  ;;  %v465_v24 = vmax.f32 %v433_v32, 0.0 }
 0x14e   :  { %557 = vst [vmem:[#allocation1 + $0x1] ss:$2 sm:$0xff] %v460_v14  ;;  %v553_v41 = vld.sshfl [vmem:[#allocation1 + $0x10] sm:$0xff pattern:$0x75316420]  ;;  %v466_v35 = vmax.f32 %v434_v29, 0.0 }
 0x14f   :  { %558 = vst [vmem:[#allocation1 + $0x10] ss:$2 sm:$0xff] %v461_v33  ;;  %v349_v0 = vperm.slane %v317_v31, 0  ;;  %v320_v46 = vrot.slane %v1272_v36, 6  ;;  %v437_v47 = vadd.f32 %v1305_v4, %v348_v42  ;;  %v350_v48 = vperm.slane %v318_v30, 0  ;;  %v687_v7 = vld [vmem:[%s1498_s1 + $0x188] sm:$0xff] }
 0x150   :  { %v554_v38 = vld.sshfl [vmem:[#allocation1 + $0x20] sm:$0xff pattern:$0x75316420]  ;;  %559 = vst [vmem:[#allocation1 + $0x11] ss:$2 sm:$0xff] %v462_v2  ;;  %v321_v40 = vrot.slane %v1272_v36, 7 }
 0x151   :  { %560 = vst [vmem:[#allocation1 + $0x20] ss:$2 sm:$0xff] %v463_v34  ;;  %630 = vmatmul.f32.vlgmr.msra.gmra.mxu2 %v554_v38  ;;  %v438_v57 = vadd.f32 %v1305_v4, %v349_v0  ;;  %v351_v51 = vperm.slane %v319_v43, 0  ;;  %v467_v3 = vmax.f32 %v435_v44, 0.0  ;;  %v468_v52 = vmax.f32 %v436_v45, 0.0  ;;  %v686_v13 = vld [vmem:[%s1498_s1 + $0x180] sm:$0xff] }
 0x152   :  { %561 = vst [vmem:[#allocation1 + $0x21] ss:$2 sm:$0xff] %v464_v37  ;;  %v555_v49 = vld.sshfl [vmem:[#allocation1 + $0x30] sm:$0xff pattern:$0x75316420]  ;;  %v439_v58 = vadd.f32 %v1305_v4, %v350_v48  ;;  %v352_v55 = vperm.slane %v320_v46, 0 }
 0x153   :  { %562 = vst [vmem:[#allocation1 + $0x30] ss:$2 sm:$0xff] %v465_v24  ;;  %v440_v62 = vadd.f32 %v1305_v4, %v351_v51  ;;  %v469_v39 = vmax.f32 %v437_v47, 0.0  ;;  %v353_v18 = vperm.slane %v321_v40, 0  ;;  %v470_v36 = vmax.f32 %v438_v57, 0.0  ;;  %v685_v59 = vld [vmem:[%s1498_s1 + $0x178] sm:$0xff] }
 0x154   :  { %618 = vmatmul.f32.gmra.mxu1 %v542_v5  ;;  %563 = vst [vmem:[#allocation1 + $0x31] ss:$2 sm:$0xff] %v466_v35  ;;  %v441_v20 = vadd.f32 %v1305_v4, %v352_v55  ;;  %v471_v56 = vmax.f32 %v439_v58, 0.0  ;;  %v688_v5 = vld [vmem:[%s1498_s1 + $0x190] sm:$0xff]  ;;  %v683_v17 = vld [vmem:[%s1498_s1 + $0x168] sm:$0xff]  ;;  %v682_v21 = vld [vmem:[%s1498_s1 + $0x160] sm:$0xff] }
 0x155   :  { %v564_v60 = vld.sshfl [vmem:[#allocation1] sm:$0xff pattern:$0x75316420]  ;;  %v442_v8 = vadd.f32 %v1305_v4, %v353_v18  ;;  %v472_v63 = vmax.f32 %v440_v62, 0.0  ;;  %v692_v4 = vld [vmem:[%s1498_s1 + $0x1b0] sm:$0xff]  ;;  %v681_v22 = vld [vmem:[%s1498_s1 + $0x158] sm:$0xff] }
 0x156   :  { %568 = vst [vmem:[#allocation1] ss:$2 sm:$0xff] %v467_v3  ;;  %v473_v1 = vmax.f32 %v441_v20, 0.0  ;;  %695 = vmatpush.msrb.mxu0 %v692_v4  ;;  %954 = vmatpush.msrb.mxu3 %v692_v4  ;;  %v684_v54 = vld [vmem:[%s1498_s1 + $0x170] sm:$0xff]  ;;  %v679_v19 = vld [vmem:[%s1498_s1 + $0x148] sm:$0xff]  ;;  %v678_v26 = vld [vmem:[%s1498_s1 + $0x140] sm:$0xff] }
 0x157   :  { %569 = vst [vmem:[#allocation1 + $0x1] ss:$2 sm:$0xff] %v468_v52  ;;  %v565_v16 = vld.sshfl [vmem:[#allocation1 + $0x10] sm:$0xff pattern:$0x75316420]  ;;  %v474_v61 = vmax.f32 %v442_v8, 0.0 }
 0x158   :  { %570 = vst [vmem:[#allocation1 + $0x10] ss:$2 sm:$0xff] %v469_v39  ;;  %696 = vmatpush.msrb.mxu0 %v691_v9  ;;  %955 = vmatpush.msrb.mxu3 %v691_v9  ;;  %v677_v28 = vld [vmem:[%s1498_s1 + $0x138] sm:$0xff] }
 0x159   :  { %633 = vmatmul.f32.gmra.mxu2 %v555_v49  ;;  %571 = vst [vmem:[#allocation1 + $0x11] ss:$2 sm:$0xff] %v470_v36  ;;  %v566_v27 = vld.sshfl [vmem:[#allocation1 + $0x20] sm:$0xff pattern:$0x75316420] }
 0x15a   :  { %572 = vst [vmem:[#allocation1 + $0x20] ss:$2 sm:$0xff] %v471_v56  ;;  %697 = vmatpush.msrb.mxu0 %v690_v10  ;;  %956 = vmatpush.msrb.mxu3 %v690_v10  ;;  %v971_v31 = vld [vmem:[%s1498_s1 + $0x278] ss:$0 sm:$0xff] }
 0x15b   :  { %573 = vst [vmem:[#allocation1 + $0x21] ss:$2 sm:$0xff] %v472_v63  ;;  %v567_v6 = vld.sshfl [vmem:[#allocation1 + $0x30] sm:$0xff pattern:$0x75316420] }
 0x15c   :  { %621 = vmatmul.f32.gmra.mxu1 %v1315_v50  ;;  %574 = vst [vmem:[#allocation1 + $0x30] ss:$2 sm:$0xff] %v473_v1  ;;  %698 = vmatpush.msrb.mxu0 %v689_v11  ;;  %v680_v50 = vld [vmem:[%s1498_s1 + $0x150] sm:$0xff] }
 0x15d   :  { %575 = vst [vmem:[#allocation1 + $0x31] ss:$2 sm:$0xff] %v474_v61  ;;  %957 = vmatpush.msrb.mxu3 %v689_v11 }
 0x15e   :  { %v576_v12 = vld.sshfl [vmem:[#allocation1] sm:$0xff pattern:$0x75316420]  ;;  %699 = vmatpush.msrb.mxu0 %v688_v5 }
 0x15f   :  { %958 = vmatpush.msrb.mxu3 %v688_v5 }
 0x160   :  { %700 = vmatpush.msrb.mxu0 %v687_v7  ;;  %v577_v15 = vld.sshfl [vmem:[#allocation1 + $0x10] sm:$0xff pattern:$0x75316420] }
 0x161   :  { %636 = vmatmul.f32.gmra.mxu2 %v564_v60  ;;  %959 = vmatpush.msrb.mxu3 %v687_v7 }
 0x162   :  { %701 = vmatpush.msrb.mxu0 %v686_v13  ;;  %v578_v25 = vld.sshfl [vmem:[#allocation1 + $0x20] sm:$0xff pattern:$0x75316420] }
 0x163   :  { %960 = vmatpush.msrb.mxu3 %v686_v13 }
 0x164   :  { %624 = vmatmul.f32.gmra.mxu1 %v552_v23  ;;  %702 = vmatpush.msrb.mxu0 %v685_v59  ;;  %v579_v14 = vld.sshfl [vmem:[#allocation1 + $0x30] sm:$0xff pattern:$0x75316420] }
 0x165   :  { %961 = vmatpush.msrb.mxu3 %v685_v59 }
 0x166   :  { %703 = vmatpush.msrb.mxu0 %v684_v54 }
 0x167   :  { %962 = vmatpush.msrb.mxu3 %v684_v54 }
 0x168   :  { %704 = vmatpush.msrb.mxu0 %v683_v17 }
 0x169   :  { %639 = vmatmul.f32.gmra.mxu2 %v565_v16  ;;  %963 = vmatpush.msrb.mxu3 %v683_v17 }
 0x16a   :  { %705 = vmatpush.msrb.mxu0 %v682_v21 }
 0x16b   :  { %964 = vmatpush.msrb.mxu3 %v682_v21 }
 0x16c   :  { %627 = vmatmul.f32.gmra.mxu1 %v553_v41  ;;  %706 = vmatpush.msrb.mxu0 %v681_v22 }
 0x16d   :  { %965 = vmatpush.msrb.mxu3 %v681_v22 }
 0x16e   :  { %707 = vmatpush.msrb.mxu0 %v680_v50 }
 0x16f   :  { %966 = vmatpush.msrb.mxu3 %v680_v50 }
 0x170   :  { %708 = vmatpush.msrb.mxu0 %v679_v19 }
 0x171   :  { %642 = vmatmul.f32.gmra.mxu2 %v566_v27  ;;  %967 = vmatpush.msrb.mxu3 %v679_v19 }
 0x172   :  { %709 = vmatpush.msrb.mxu0 %v678_v26 }
 0x173   :  { %968 = vmatpush.msrb.mxu3 %v678_v26 }
 0x174   :  { %710 = vmatpush.msrb.mxu0 %v677_v28 }
 0x175   :  { %969 = vmatpush.msrb.mxu3 %v677_v28 }
 0x179   :  { %645 = vmatmul.f32.gmra.mxu2 %v567_v6 }
 0x181   :  { %648 = vmatmul.f32.gmra.mxu2 %v576_v12 }
 0x189   :  { %651 = vmatmul.f32.gmra.mxu2 %v577_v15  ;;  %v1392_v15 = vld [vmem:[%s1498_s1 + $0x279] ss:$0 sm:$0xff] }
 0x191   :  { %654 = vmatmul.f32.gmra.mxu2 %v578_v25 }
 0x199   :  { %657 = vmatmul.f32.gmra.mxu2 %v579_v14 }
 0x1c1   :  { %v613_v53 = vpop.f32.mrf.mxu1 }
 0x1c2   :  { %v614_v32 = vadd.f32 %v971_v31, %v613_v53 }
 0x1c4   :  { %v661_v23 = vmax.f32 %v614_v32, 0.0 }
 0x1c6   :  { %711 = vmatmul.f32.vlgmr.msrb.gmra.mxu0 %v661_v23  ;;  %v817_v23 = vld [vmem:[%s1498_s1 + $0x230] sm:$0xff] }
 0x1c7   :  { %824 = vmatpush.msrb.mxu1 %v817_v23 }
 0x1c9   :  { %v616_v33 = vpop.f32.mrf.mxu1 }
 0x1ca   :  { %v617_v34 = vadd.f32 %v971_v31, %v616_v33  ;;  %v816_v33 = vld [vmem:[%s1498_s1 + $0x228] sm:$0xff] }
 0x1cb   :  { %825 = vmatpush.msrb.mxu1 %v816_v33 }
 0x1cc   :  { %v662_v29 = vmax.f32 %v617_v34, 0.0 }
 0x1ce   :  { %714 = vmatmul.f32.gmra.mxu0 %v662_v29 }
 0x1d1   :  { %v619_v2 = vpop.f32.mrf.mxu1 }
 0x1d2   :  { %v620_v30 = vadd.f32 %v971_v31, %v619_v2 }
 0x1d4   :  { %v631_v37 = vpop.f32.mrf.mxu2  ;;  %v663_v41 = vmax.f32 %v620_v30, 0.0 }
 0x1d5   :  { %v632_v42 = vadd.f32 %v971_v31, %v631_v37 }
 0x1d6   :  { %717 = vmatmul.f32.gmra.mxu0 %v663_v41 }
 0x1d7   :  { %v667_v43 = vmax.f32 %v632_v42, 0.0 }
 0x1d9   :  { %729 = vmatmul.f32.vlgmr.msrb.gmra.mxu3 %v667_v43  ;;  %v622_v38 = vpop.f32.mrf.mxu1 }
 0x1da   :  { %v623_v24 = vadd.f32 %v971_v31, %v622_v38 }
 0x1dc   :  { %v634_v44 = vpop.f32.mrf.mxu2  ;;  %v664_v45 = vmax.f32 %v623_v24, 0.0 }
 0x1dd   :  { %v635_v35 = vadd.f32 %v971_v31, %v634_v44 }
 0x1de   :  { %720 = vmatmul.f32.gmra.mxu0 %v664_v45 }
 0x1df   :  { %v668_v0 = vmax.f32 %v635_v35, 0.0  ;;  %v815_v35 = vld [vmem:[%s1498_s1 + $0x220] sm:$0xff] }
 0x1e0   :  { %826 = vmatpush.msrb.mxu1 %v815_v35  ;;  %v878_v35 = vld [vmem:[%s1498_s1 + $0x270] sm:$0xff] }
 0x1e1   :  { %732 = vmatmul.f32.gmra.mxu3 %v668_v0  ;;  %v625_v46 = vpop.f32.mrf.mxu1  ;;  %v814_v0 = vld [vmem:[%s1498_s1 + $0x218] sm:$0xff]  ;;  %896 = vmatpush.msra.mxu0 %v878_v35 }
 0x1e2   :  { %v626_v47 = vadd.f32 %v971_v31, %v625_v46  ;;  %827 = vmatpush.msrb.mxu1 %v814_v0  ;;  %v877_v0 = vld [vmem:[%s1498_s1 + $0x268] sm:$0xff] }
 0x1e3   :  { %897 = vmatpush.msra.mxu0 %v877_v0 }
 0x1e4   :  { %v637_v48 = vpop.f32.mrf.mxu2  ;;  %v665_v40 = vmax.f32 %v626_v47, 0.0 }
 0x1e5   :  { %v638_v49 = vadd.f32 %v971_v31, %v637_v48 }
 0x1e6   :  { %723 = vmatmul.f32.gmra.mxu0 %v665_v40 }
 0x1e7   :  { %v669_v57 = vmax.f32 %v638_v49, 0.0  ;;  %v813_v49 = vld [vmem:[%s1498_s1 + $0x210] sm:$0xff] }
 0x1e8   :  { %828 = vmatpush.msrb.mxu1 %v813_v49 }
 0x1e9   :  { %735 = vmatmul.f32.gmra.mxu3 %v669_v57  ;;  %v628_v51 = vpop.f32.mrf.mxu1  ;;  %v812_v57 = vld [vmem:[%s1498_s1 + $0x208] sm:$0xff] }
 0x1ea   :  { %v629_v3 = vadd.f32 %v971_v31, %v628_v51  ;;  %v811_v51 = vld [vmem:[%s1498_s1 + $0x200] sm:$0xff]  ;;  %829 = vmatpush.msrb.mxu1 %v812_v57 }
 0x1ec   :  { %v640_v52 = vpop.f32.mrf.mxu2  ;;  %v666_v58 = vmax.f32 %v629_v3, 0.0  ;;  %830 = vmatpush.msrb.mxu1 %v811_v51  ;;  %v974_v51 = vld [vmem:[%s1498_s1 + $0x27b] ss:$0 sm:$0xff] }
 0x1ed   :  { %v641_v60 = vadd.f32 %v971_v31, %v640_v52  ;;  %v810_v52 = vld [vmem:[%s1498_s1 + $0x1f8] sm:$0xff] }
 0x1ee   :  { %726 = vmatmul.f32.gmra.mxu0 %v666_v58  ;;  %v809_v58 = vld [vmem:[%s1498_s1 + $0x1f0] sm:$0xff]  ;;  %831 = vmatpush.msrb.mxu1 %v810_v52 }
 0x1ef   :  { %v670_v62 = vmax.f32 %v641_v60, 0.0  ;;  %v808_v60 = vld [vmem:[%s1498_s1 + $0x1e8] sm:$0xff] }
 0x1f0   :  { %832 = vmatpush.msrb.mxu1 %v809_v58 }
 0x1f1   :  { %738 = vmatmul.f32.gmra.mxu3 %v670_v62 }
 0x1f2   :  { %833 = vmatpush.msrb.mxu1 %v808_v60  ;;  %v975_v60 = vld [vmem:[%s1498_s1 + $0x27c] ss:$0 sm:$0xff] }
 0x1f4   :  { %v643_v55 = vpop.f32.mrf.mxu2 }
 0x1f5   :  { %v644_v39 = vadd.f32 %v971_v31, %v643_v55 }
 0x1f7   :  { %v671_v18 = vmax.f32 %v644_v39, 0.0  ;;  %v807_v39 = vld [vmem:[%s1498_s1 + $0x1e0] sm:$0xff] }
 0x1f8   :  { %834 = vmatpush.msrb.mxu1 %v807_v39 }
 0x1f9   :  { %741 = vmatmul.f32.gmra.mxu3 %v671_v18  ;;  %v806_v18 = vld [vmem:[%s1498_s1 + $0x1d8] sm:$0xff] }
 0x1fa   :  { %835 = vmatpush.msrb.mxu1 %v806_v18 }
 0x1fc   :  { %v646_v36 = vpop.f32.mrf.mxu2 }
 0x1fd   :  { %v647_v16 = vadd.f32 %v971_v31, %v646_v36 }
 0x1ff   :  { %v672_v20 = vmax.f32 %v647_v16, 0.0 }
 0x201   :  { %744 = vmatmul.f32.gmra.mxu3 %v672_v20  ;;  %v805_v20 = vld [vmem:[%s1498_s1 + $0x1d0] sm:$0xff] }
 0x202   :  { %836 = vmatpush.msrb.mxu1 %v805_v20 }
 0x204   :  { %v649_v56 = vpop.f32.mrf.mxu2 }
 0x205   :  { %v650_v8 = vadd.f32 %v971_v31, %v649_v56 }
 0x207   :  { %v673_v63 = vmax.f32 %v650_v8, 0.0 }
 0x209   :  { %747 = vmatmul.f32.gmra.mxu3 %v673_v63  ;;  %v804_v63 = vld [vmem:[%s1498_s1 + $0x1c8] sm:$0xff] }
 0x20a   :  { %837 = vmatpush.msrb.mxu1 %v804_v63 }
 0x20c   :  { %v652_v27 = vpop.f32.mrf.mxu2 }
 0x20d   :  { %v653_v1 = vadd.f32 %v971_v31, %v652_v27 }
 0x20f   :  { %v674_v61 = vmax.f32 %v653_v1, 0.0 }
 0x211   :  { %750 = vmatmul.f32.gmra.mxu3 %v674_v61  ;;  %v803_v61 = vld [vmem:[%s1498_s1 + $0x1c0] sm:$0xff] }
 0x212   :  { %838 = vmatpush.msrb.mxu1 %v803_v61 }
 0x214   :  { %v655_v6 = vpop.f32.mrf.mxu2 }
 0x215   :  { %v656_v4 = vadd.f32 %v971_v31, %v655_v6 }
 0x217   :  { %v675_v9 = vmax.f32 %v656_v4, 0.0 }
 0x219   :  { %753 = vmatmul.f32.gmra.mxu3 %v675_v9 }
 0x21c   :  { %v658_v10 = vpop.f32.mrf.mxu2 }
 0x21d   :  { %v659_v11 = vadd.f32 %v971_v31, %v658_v10  ;;  %v802_v10 = vld [vmem:[%s1498_s1 + $0x1b8] sm:$0xff] }
 0x21e   :  { %839 = vmatpush.msrb.mxu1 %v802_v10 }
 0x21f   :  { %v676_v5 = vmax.f32 %v659_v11, 0.0 }
 0x221   :  { %756 = vmatmul.f32.gmra.mxu3 %v676_v5  ;;  %v848_v5 = vld [vmem:[%s1498_s1 + $0x250] sm:$0xff] }
 0x222   :  { %866 = vmatpush.msra.mxu1 %v848_v5 }
 0x243   :  { %v712_v12 = vpop.f32.mrf.mxu0 }
 0x244   :  { %v713_v21 = vadd.f32 %v1392_v15, %v712_v12 }
 0x246   :  { %v760_v26 = vmax.f32 %v713_v21, 0.0 }
 0x24b   :  { %v715_v7 = vpop.f32.mrf.mxu0 }
 0x24c   :  { %v716_v17 = vadd.f32 %v1392_v15, %v715_v7 }
 0x24e   :  { %v761_v25 = vmax.f32 %v716_v17, 0.0 }
 0x250   :  { %v776_v53 = vadd.f32 %v761_v25, %v760_v26 }
 0x253   :  { %v718_v13 = vpop.f32.mrf.mxu0 }
 0x254   :  { %v719_v22 = vadd.f32 %v1392_v15, %v718_v13 }
 0x256   :  { %v762_v28 = vmax.f32 %v719_v22, 0.0 }
 0x258   :  { %v777_v34 = vadd.f32 %v776_v53, %v762_v28 }
 0x25b   :  { %v721_v59 = vpop.f32.mrf.mxu0 }
 0x25c   :  { %v730_v54 = vpop.f32.mrf.mxu3  ;;  %v722_v14 = vadd.f32 %v1392_v15, %v721_v59  ;;  %v847_v59 = vld [vmem:[%s1498_s1 + $0x248] sm:$0xff] }
 0x25d   :  { %v731_v30 = vadd.f32 %v1392_v15, %v730_v54  ;;  %867 = vmatpush.msra.mxu1 %v847_v59 }
 0x25e   :  { %v763_v32 = vmax.f32 %v722_v14, 0.0 }
 0x25f   :  { %v766_v44 = vmax.f32 %v731_v30, 0.0 }
 0x260   :  { %v778_v37 = vadd.f32 %v777_v34, %v763_v32 }
 0x263   :  { %v724_v50 = vpop.f32.mrf.mxu0 }
 0x264   :  { %v733_v19 = vpop.f32.mrf.mxu3  ;;  %v725_v31 = vadd.f32 %v1392_v15, %v724_v50 }
 0x265   :  { %v734_v43 = vadd.f32 %v1392_v15, %v733_v19 }
 0x266   :  { %v764_v29 = vmax.f32 %v725_v31, 0.0 }
 0x267   :  { %v767_v46 = vmax.f32 %v734_v43, 0.0 }
 0x268   :  { %v779_v38 = vadd.f32 %v778_v37, %v764_v29 }
 0x26b   :  { %v727_v2 = vpop.f32.mrf.mxu0 }
 0x26c   :  { %v736_v41 = vpop.f32.mrf.mxu3  ;;  %v728_v42 = vadd.f32 %v1392_v15, %v727_v2 }
 0x26d   :  { %v737_v56 = vadd.f32 %v1392_v15, %v736_v41 }
 0x26e   :  { %v765_v24 = vmax.f32 %v728_v42, 0.0 }
 0x26f   :  { %v768_v6 = vmax.f32 %v737_v56, 0.0 }
 0x270   :  { %v780_v45 = vadd.f32 %v779_v38, %v765_v24 }
 0x272   :  { %v781_v47 = vadd.f32 %v780_v45, %v766_v44  ;;  %v845_v45 = vld [vmem:[%s1498_s1 + $0x238] sm:$0xff] }
 0x274   :  { %v782_v48 = vadd.f32 %v781_v47, %v767_v46  ;;  %v739_v40 = vpop.f32.mrf.mxu3  ;;  %v876_v46 = vld [vmem:[%s1498_s1 + $0x260] sm:$0xff]  ;;  %v875_v47 = vld [vmem:[%s1498_s1 + $0x258] sm:$0xff] }
 0x275   :  { %v740_v16 = vadd.f32 %v1392_v15, %v739_v40  ;;  %898 = vmatpush.msra.mxu0 %v876_v46 }
 0x276   :  { %v783_v22 = vrot.slane %v782_v48, 4 }
 0x277   :  { %v769_v27 = vmax.f32 %v740_v16, 0.0  ;;  %899 = vmatpush.msra.mxu0 %v875_v47 }
 0x278   :  { %v784_v28 = vadd.f32 %v783_v22, %v782_v48  ;;  %v973_v48 = vld [vmem:[%s1498_s1 + $0x27a] ss:$0 sm:$0xff] }
 0x279   :  { %v789_v12 = vadd.f32 %v769_v27, %v768_v6 }
 0x27a   :  { %v785_v33 = vrot.slane %v784_v28, 2 }
 0x27c   :  { %v742_v3 = vpop.f32.mrf.mxu3  ;;  %v786_v30 = vadd.f32 %v785_v33, %v784_v28 }
 0x27d   :  { %v743_v8 = vadd.f32 %v1392_v15, %v742_v3 }
 0x27e   :  { %v787_v42 = vrot.slane %v786_v30, 1 }
 0x27f   :  { %v770_v4 = vmax.f32 %v743_v8, 0.0 }
 0x280   :  { %v788_v38 = vadd.f32 %v787_v42, %v786_v30 }
 0x281   :  { %v790_v54 = vadd.f32 %v789_v12, %v770_v4 }
 0x284   :  { %v745_v62 = vpop.f32.mrf.mxu3 }
 0x285   :  { %v746_v1 = vadd.f32 %v1392_v15, %v745_v62 }
 0x287   :  { %v771_v7 = vmax.f32 %v746_v1, 0.0 }
 0x289   :  { %v791_v50 = vadd.f32 %v790_v54, %v771_v7 }
 0x28c   :  { %v748_v55 = vpop.f32.mrf.mxu3 }
 0x28d   :  { %v749_v9 = vadd.f32 %v1392_v15, %v748_v55 }
 0x28f   :  { %v772_v17 = vmax.f32 %v749_v9, 0.0 }
 0x291   :  { %v792_v14 = vadd.f32 %v791_v50, %v772_v17 }
 0x294   :  { %v751_v36 = vpop.f32.mrf.mxu3 }
 0x295   :  { %v752_v13 = vadd.f32 %v1392_v15, %v751_v36 }
 0x297   :  { %v773_v25 = vmax.f32 %v752_v13, 0.0 }
 0x299   :  { %v793_v31 = vadd.f32 %v792_v14, %v773_v25 }
 0x29c   :  { %v754_v11 = vpop.f32.mrf.mxu3 }
 0x29d   :  { %v755_v21 = vadd.f32 %v1392_v15, %v754_v11 }
 0x29f   :  { %v774_v19 = vmax.f32 %v755_v21, 0.0 }
 0x2a1   :  { %v794_v32 = vadd.f32 %v793_v31, %v774_v19 }
 0x2a4   :  { %v757_v26 = vpop.f32.mrf.mxu3 }
 0x2a5   :  { %v758_v53 = vadd.f32 %v1392_v15, %v757_v26  ;;  %v846_v15 = vld [vmem:[%s1498_s1 + $0x240] sm:$0xff] }
 0x2a6   :  { %868 = vmatpush.msra.mxu1 %v846_v15 }
 0x2a7   :  { %v775_v23 = vmax.f32 %v758_v53, 0.0 }
 0x2a8   :  { %869 = vmatpush.msra.mxu1 %v845_v45 }
 0x2a9   :  { %v795_v34 = vadd.f32 %v794_v32, %v775_v23 }
 0x2ab   :  { %v796_v29 = vrot.slane %v795_v34, 4 }
 0x2ad   :  { %v797_v2 = vadd.f32 %v796_v29, %v795_v34 }
 0x2af   :  { %v798_v37 = vrot.slane %v797_v2, 2 }
 0x2b1   :  { %v799_v41 = vadd.f32 %v798_v37, %v797_v2 }
 0x2b3   :  { %v800_v43 = vrot.slane %v799_v41, 1 }
 0x2b5   :  { %v801_v24 = vadd.f32 %v800_v43, %v799_v41 }
 0x2b7   :  { %v822_v44 = vsel %vm395_vm4, %v801_v24, %v788_v38 }
 0x2b8   :  { %840 = vmatmul.f32.vlgmr.msrb.gmra.mxu1 %v822_v44 }
 0x335   :  { %v841_v40 = vpop.f32.mrf.mxu1 }
 0x336   :  { %v842_v49 = vadd.f32 %v973_v48, %v841_v40 }
 0x338   :  { %v844_v57 = vmax.f32 %v842_v49, 0.0 }
 0x33a   :  { %936 = vmatmul.msk.f32.vlgmr.msra.gmra.mxu1 %vm77_vm1, %v844_v57 }
 0x3b7   :  { %v871_v3 = vpop.f32.mrf.mxu1 }
 0x3b8   :  { %v872_v52 = vadd.f32 %v974_v51, %v871_v3 }
 0x3ba   :  { %v874_v58 = vmax.f32 %v872_v52, 0.0 }
 0x3bc   :  { %937 = vmatmul.msk.f32.vlgmr.msra.gmra.mxu0 %vm77_vm1, %v874_v58 }
 0x439   :  { %v901_v62 = vpop.f32.mrf.mxu0 }
 0x43a   :  { %v902_v55 = vadd.f32 %v975_v60, %v901_v62 }
 0x43c   :  { %904 = vst [vmem:[#allocation2] sm:$0x3] %v902_v55 }
 0x43d   :  { %915 = dma.vmem_to_hbm [thread:$0]  %s911_s15, 32, %s913_s18, [#allocation3]  }
 0x43e   :  { %1000 = dma.done.wait [#allocation3], 32  }
 0x43f   :  { %1001 = vsyncadd [#allocation3], 4294967264 }
 0x440   :  { %920 = vsyncpa [#allocation3], 1 }

</bundles_post_ra>
